<compile_context>
chip_gen: v5e
topology: v5e:2x2
jax: 0.10.0
libtpu: 0.0.40
codegen_flags: <defaults>
</compile_context>

<pallas_src>
import functools

import jax
import jax.numpy as jnp
import numpy as np
from jax.experimental import pallas as pl
from jax.experimental.pallas import tpu as pltpu

LANES = 128                 # vreg lane width
SUBLANES = 8                # vreg sublane count
DEFAULT_TILE_ROWS = 2048    # 2048 x 128 x 4 B = 1 MiB per f32 input block
NUM_CORES = 2               # megacore split on v7x; harmless on 1-TC chips


def _l1_partial_kernel(a_ref, b_ref, o_ref, *, valid_rows):
    """Accumulate per-core partial sums of |a - b| into an (8,128) f32 block.

    a_ref, b_ref : (tile_rows, 128) input tiles, native dtype (f32/bf16/...)
    o_ref        : (8, 128) f32 per-core partial-sum accumulator (same output
                   block revisited across the inner "arbitrary" grid axis).
    valid_rows   : static row count of the full (rows, 128) input; rows past
                   it (partial / clamped tiles) are masked to zero.
    """
    c = pl.program_id(0)
    s = pl.program_id(1)
    steps_per_core = pl.num_programs(1)

    @pl.when(s == 0)
    def _():
        o_ref[...] = jnp.zeros_like(o_ref)

    tr = a_ref.shape[0]
    gi = c * steps_per_core + s          # global (unclamped) block index
    row_start = gi * tr

    # Upcast immediately after load (v5e has no bf16 VALU); accumulate in f32.
    a = a_ref[...].astype(jnp.float32)
    b = b_ref[...].astype(jnp.float32)
    d = jnp.abs(a - b)                   # VPU

    # Mask rows that fall past the end of the array (last partial tile and
    # clamped overshoot tiles contribute exactly zero).
    row_ids = jax.lax.broadcasted_iota(jnp.int32, (tr, LANES), 0)
    d = jnp.where(row_start + row_ids < valid_rows, d, 0.0)

    # Fold the tile into the (8,128) accumulator with pure VPU adds
    # (no per-step cross-lane/sublane XLU reduce; better f32 accuracy).
    o_ref[...] += d.reshape(tr // SUBLANES, SUBLANES, LANES).sum(axis=0)


def l1_loss(output, target, *, tile_rows=DEFAULT_TILE_ROWS):
    """mean(|output - target|) — matches torch.nn.L1Loss()(output, target)."""
    assert output.shape == target.shape, (output.shape, target.shape)
    n = int(np.prod(output.shape)) if output.ndim else 1

    out_dtype = jnp.result_type(output.dtype, target.dtype)
    if not jnp.issubdtype(out_dtype, jnp.floating):
        out_dtype = jnp.float32

    if n == 0:
        return jnp.array(jnp.nan, dtype=out_dtype)   # torch returns nan

    a = output.reshape(-1)    # row-major flatten: bitcast, native dtype kept
    b = target.reshape(-1)

    # Tiny inputs: a kernel launch is pure overhead.
    if n < SUBLANES * LANES:
        s = jnp.sum(jnp.abs(a.astype(jnp.float32) - b.astype(jnp.float32)))
        return (s / n).astype(out_dtype)

    # Lane-dense main part (rows, 128) with rows >= 8; the (<128-element)
    # ragged tail is summed outside the kernel -> no whole-array pad pass.
    rows = n // LANES
    n_main = rows * LANES
    tail_sum = jnp.float32(0.0)
    if n_main < n:
        ta = a[n_main:].astype(jnp.float32)
        tb = b[n_main:].astype(jnp.float32)
        tail_sum = jnp.sum(jnp.abs(ta - tb))
        a_main, b_main = a[:n_main], b[:n_main]
    else:
        a_main, b_main = a, b
    a2 = a_main.reshape(rows, LANES)
    b2 = b_main.reshape(rows, LANES)

    # Block rows: multiple of 8 and <= rows so every BlockSpec dim is legal;
    # the last (partial) tile is masked inside the kernel.
    tile_rows = min(tile_rows, (rows // SUBLANES) * SUBLANES)
    total_steps = pl.cdiv(rows, tile_rows)
    steps_per_core = pl.cdiv(total_steps, NUM_CORES)

    def in_map(c, s):
        # Clamp overshoot steps (uneven core split) into bounds; the kernel's
        # row mask zeroes their contribution.
        return (jnp.minimum(c * steps_per_core + s, total_steps - 1), 0)

    itemsize = a2.dtype.itemsize
    kernel = functools.partial(_l1_partial_kernel, valid_rows=rows)

    partials = pl.pallas_call(
        kernel,
        out_shape=jax.ShapeDtypeStruct((NUM_CORES * SUBLANES, LANES),
                                       jnp.float32),
        grid_spec=pltpu.PrefetchScalarGridSpec(
            num_scalar_prefetch=0,
            grid=(NUM_CORES, steps_per_core),
            in_specs=[
                pl.BlockSpec((tile_rows, LANES), in_map),
                pl.BlockSpec((tile_rows, LANES), in_map),
            ],
            out_specs=pl.BlockSpec((SUBLANES, LANES), lambda c, s: (c, 0)),
        ),
        compiler_params=pltpu.CompilerParams(
            dimension_semantics=("parallel", "arbitrary")),
        cost_estimate=pl.CostEstimate(
            flops=3 * n_main,
            transcendentals=0,
            bytes_accessed=2 * n_main * itemsize
            + NUM_CORES * SUBLANES * LANES * 4),
    )(a2, b2)

    # Final cross-lane reduce of the tiny (16,128) partial block + 1/N scale.
    total = jnp.sum(partials) + tail_sum
    return (total / n).astype(out_dtype)


l1_loss_jit = jax.jit(l1_loss)


if __name__ == "__main__":
    key = jax.random.PRNGKey(0)
    k1, k2, k3, k4 = jax.random.split(key, 4)

    # Typical loss-call shape: batch=2, channels=4, 16x16 spatial.
    shape = (2, 4, 16, 16)
    out1 = jax.random.normal(k1, shape, jnp.float32)
    tgt1 = jax.random.normal(k2, shape, jnp.float32)
    loss1 = jax.block_until_ready(l1_loss_jit(out1, tgt1))
    ref1 = jnp.mean(jnp.abs(out1 - tgt1))
    np.testing.assert_allclose(np.asarray(loss1), np.asarray(ref1),
                               rtol=1e-5, atol=1e-6)

    # Ragged size (not a multiple of 128): exercises partial-tile mask + tail.
    shape2 = (3, 5, 7, 11)
    out2 = jax.random.normal(k3, shape2, jnp.float32)
    tgt2 = jax.random.normal(k4, shape2, jnp.float32)
    loss2 = jax.block_until_ready(l1_loss_jit(out2, tgt2))
    ref2 = jnp.mean(jnp.abs(out2 - tgt2))
    np.testing.assert_allclose(np.asarray(loss2), np.asarray(ref2),
                               rtol=1e-5, atol=1e-6)

    print("KERNEL_OK")
</pallas_src>

<mosaic_0001>
module attributes {stable_mosaic.version = 11 : i64} {
  func.func @_l1_partial_kernel(%arg0: i32, %arg1: i32, %arg2: memref<16x128xf32, #tpu.memory_space<vmem>>, %arg3: memref<16x128xf32, #tpu.memory_space<vmem>>, %arg4: memref<8x128xf32, #tpu.memory_space<vmem>>) attributes {dimension_semantics = [#tpu.dimension_semantics<parallel>, #tpu.dimension_semantics<arbitrary>], iteration_bounds = array<i64: 2, 1>, scalar_prefetch = 0 : i64, scratch_operands = 0 : i64, tpu.core_type = #tpu.core_type<tc>, window_params = [{transform_indices = @transform_0, window_bounds = array<i64: 16, 128>}, {transform_indices = @transform_1, window_bounds = array<i64: 16, 128>}, {transform_indices = @transform_2, window_bounds = array<i64: 8, 128>}]} {
    %c0_i32 = arith.constant 0 : i32
    %0 = arith.cmpi eq, %arg1, %c0_i32 : i32
    %1 = arith.extui %0 : i1 to i32
    %c0_i32_0 = arith.constant 0 : i32
    %2 = arith.cmpi ne, %1, %c0_i32_0 : i32
    scf.if %2 {
      %cst_10 = arith.constant 0.000000e+00 : f32
      %22 = vector.broadcast %cst_10 : f32 to vector<8x128xf32>
      %c0_11 = arith.constant 0 : index
      %c0_12 = arith.constant 0 : index
      %23 = vector.load %arg4[%c0_11, %c0_12] : memref<8x128xf32, #tpu.memory_space<vmem>>, vector<8x128xf32>
      tpu.vector_store %arg4[%c0_11, %c0_12], %22 {strides = array<i32>} : memref<8x128xf32, #tpu.memory_space<vmem>>, vector<8x128xf32>,
    } else {
    }
    %c1_i32 = arith.constant 1 : i32
    %3 = arith.muli %arg0, %c1_i32 : i32
    %4 = arith.addi %3, %arg1 : i32
    %c16_i32 = arith.constant 16 : i32
    %5 = arith.muli %4, %c16_i32 : i32
    %c0 = arith.constant 0 : index
    %c0_1 = arith.constant 0 : index
    %6 = vector.load %arg2[%c0, %c0_1] : memref<16x128xf32, #tpu.memory_space<vmem>>, vector<16x128xf32>
    %c0_2 = arith.constant 0 : index
    %c0_3 = arith.constant 0 : index
    %7 = vector.load %arg3[%c0_2, %c0_3] : memref<16x128xf32, #tpu.memory_space<vmem>>, vector<16x128xf32>
    %8 = arith.subf %6, %7 : vector<16x128xf32>
    %9 = math.absf %8 : vector<16x128xf32>
    %10 = tpu.iota {dimensions = array<i32: 0>} : vector<16x128xi32>
    %11 = vector.broadcast %5 : i32 to vector<16x128xi32>
    %12 = arith.addi %11, %10 : vector<16x128xi32>
    %c16_i32_4 = arith.constant 16 : i32
    %13 = vector.broadcast %c16_i32_4 : i32 to vector<16x128xi32>
    %14 = arith.cmpi slt, %12, %13 : vector<16x128xi32>
    %cst = arith.constant 0.000000e+00 : f32
    %15 = vector.broadcast %cst : f32 to vector<16x128xf32>
    %16 = arith.select %14, %9, %15 : vector<16x128xi1>, vector<16x128xf32>
    %c0_5 = arith.constant 0 : index
    %c0_6 = arith.constant 0 : index
    %17 = vector.load %arg4[%c0_5, %c0_6] : memref<8x128xf32, #tpu.memory_space<vmem>>, vector<8x128xf32>
    %18 = vector.shape_cast %16 : vector<16x128xf32> to vector<2x8x128xf32>
    %cst_7 = arith.constant dense<0.000000e+00> : vector<8x128xf32>
    %19 = vector.multi_reduction <add>, %18, %cst_7 [0] : vector<2x8x128xf32> to vector<8x128xf32>
    %20 = arith.addf %17, %19 : vector<8x128xf32>
    %c0_8 = arith.constant 0 : index
    %c0_9 = arith.constant 0 : index
    %21 = vector.load %arg4[%c0_8, %c0_9] : memref<8x128xf32, #tpu.memory_space<vmem>>, vector<8x128xf32>
    tpu.vector_store %arg4[%c0_8, %c0_9], %20 {strides = array<i32>} : memref<8x128xf32, #tpu.memory_space<vmem>>, vector<8x128xf32>,
    return
  }
  func.func @transform_0(%arg0: i32, %arg1: i32) -> (i32, i32) {
    %c1_i32 = arith.constant 1 : i32
    %0 = arith.muli %arg0, %c1_i32 : i32
    %1 = arith.addi %0, %arg1 : i32
    %c0_i32 = arith.constant 0 : i32
    %2 = arith.minsi %1, %c0_i32 : i32
    %c0_i32_0 = arith.constant 0 : i32
    %c0_i32_1 = arith.constant 0 : i32
    return %2, %c0_i32_0 : i32, i32
  }
  func.func @transform_1(%arg0: i32, %arg1: i32) -> (i32, i32) {
    %c1_i32 = arith.constant 1 : i32
    %0 = arith.muli %arg0, %c1_i32 : i32
    %1 = arith.addi %0, %arg1 : i32
    %c0_i32 = arith.constant 0 : i32
    %2 = arith.minsi %1, %c0_i32 : i32
    %c0_i32_0 = arith.constant 0 : i32
    %c0_i32_1 = arith.constant 0 : i32
    return %2, %c0_i32_0 : i32, i32
  }
  func.func @transform_2(%arg0: i32, %arg1: i32) -> (i32, i32) {
    %c0_i32 = arith.constant 0 : i32
    %c0_i32_0 = arith.constant 0 : i32
    return %arg0, %c0_i32 : i32, i32
  }
}

</mosaic_0001>

<bundles_post_ra>
// kernel: l1_loss.1
= control target key start
LH: loop header
LB: loop body
LE: loop exit
PB: predicated region body
PF: predicated region fallthrough
CT: control target
= control target key end

     0   :  { %s399_s9 = smov 0   ;;  %s401_s10 = smov 0   ;;  %s435_s0 = inlined_call_operand.vmem [shape: f32[16,128], index: 0, kind: input, shape index: {}]   ;;  %s436_s1 = inlined_call_operand.vmem [shape: f32[16,128], index: 1, kind: input, shape index: {}]   ;;  %s437_s2 = inlined_call_operand.vmem [shape: f32[16,128], index: 2, kind: output, shape index: {}]  }
   0x1   :  { %s403_s11 = smov 0  }
   0x2 LB: > { %s24_s12 = sadd.s32 1, %s378_s10  ;;  %p326_p0 = scmp.ge.s32.totalorder %s382_s11, 1  ;;  %s382_s11 = sphi %s403_s11, %s12_s11   ;;  %s378_s10 = sphi %s401_s10, %s439_s10   ;;  %s374_s9 = sphi %s399_s9, %s438_s9  }
   0x3   : > { %p26_p1 = scmp.ge.s32.totalorder %s24_s12, 2  ;;  %p160_p2 = scmp.lt.s32.totalorder %s382_s11, 3 }
   0x5   : > { %s441_s12 = smov (%p26_p1, %s24_s12), 0  ;;  %p161_p3 = pnand %p326_p0, %p160_p2 }
   0x6   : > { %p193_p4 = scmp.lt.s32.totalorder (!%p161_p3), %s374_s9, 0  ;;  %s332_s14 = sshll.u32 (!%p161_p3), %s374_s9, 4 }
   0x7   : > { %164 = sbr.rel (%p161_p3) target bundleno = 30 (0x1e), region = 28  ;;  %p216_p6 = scmp.lt.s32.totalorder (!%p161_p3), %s374_s9, 1 }
   0xc   : > { %v235_v0 = vlaneseq  ;;  %s194_s13 = scalar_select %p193_p4, %s374_s9, 0  ;;  %v238_v3 = vstv %s332_s14 }
   0xd   : > { %s445_s9 = smov (!%p216_p6, %s374_s9), 1 }
   0xe   : > { %v236_v1 = vshrl.u32 %v235_v0, 7  ;;  %s327_s15 = sshll.u32 %s194_s13, 1  ;;  %s331_s23 = sshll.u32 %s445_s9, 3 }
   0xf   : > { %p196_p5 = scmp.lt.s32.totalorder %s327_s15, 1  ;;  %s219_s26 = scalar_lea.vmem %s437_s2, %s331_s23 }
  0x10   : > { %v237_v2 = vadd.s32 8, %v236_v1  ;;  %v239_v4 = vadd.s32 %v238_v3, %v236_v1 }
  0x11   : > { %s443_s15 = smov (!%p196_p5, %s327_s15), 1 }
  0x12   : > { %s328_s16 = sshll.u32 %s443_s15, 3  ;;  %v240_v5 = vadd.s32 %v238_v3, %v237_v2  ;;  %vm241_vm0 = vcmp.lt.s32.totalorder %v239_v4, 16 }
  0x13   : > { %s199_s19 = scalar_lea.vmem %s435_s0, %s328_s16  ;;  %s211_s22 = scalar_lea.vmem %s436_s1, %s328_s16 }
  0x14   : > { %v227_v6 = vld [vmem:[%s199_s19] sm:$0xff]  ;;  %v228_v7 = vld [vmem:[%s199_s19 + $0x8] sm:$0xff]  ;;  %vm242_vm1 = vcmp.lt.s32.totalorder %v240_v5, 16 }
  0x15   : > { %v229_v8 = vld [vmem:[%s211_s22] sm:$0xff]  ;;  %v230_v9 = vld [vmem:[%s211_s22 + $0x8] sm:$0xff] }
  0x16   : > { %v231_v10 = vsub.f32 %v227_v6, %v229_v8  ;;  %v232_v11 = vsub.f32 %v228_v7, %v230_v9 }
  0x18   : > { %v233_v12 = vand.u32 2147483647, %v231_v10  ;;  %v234_v13 = vand.u32 2147483647, %v232_v11 }
  0x1a   : > { %v243_v14 = vsel %vm241_vm0, %v233_v12, 0.0  ;;  %v244_v15 = vsel %vm242_vm1, %v234_v13, 0.0 }
  0x1b   : > { %v246_v16 = vadd.f32 %v244_v15, %v243_v14 }
  0x1d   : > { %248 = vst [vmem:[%s219_s26] sm:$0xff] %v246_v16 }
  0x1e PF: > { %s12_s11 = sadd.s32 1, %s382_s11   ;;  %s438_s9 = smov %s378_s10 }
  0x1f   : > { %p9_p7 = scmp.ge.s32.totalorder %s12_s11, 4   ;;  %s439_s10 = smov %s441_s12 }
  0x21   :  { %11 = sbr.rel (!%p9_p7) target bundleno = 2 (0x2), region = 65 }

</bundles_post_ra>
